<compile_context>
chip_gen: v5e
topology: v5e:2x2
jax: 0.10.0
libtpu: 0.0.40
codegen_flags: <defaults>
</compile_context>

<pallas_src>
import functools

import jax
import jax.numpy as jnp
from jax import lax
from jax.experimental import pallas as pl
from jax.experimental.pallas import tpu as pltpu

LN_EPS = 1e-5


def _residual_ln_kernel(*refs, use_mask):
    """Fused: y = x @ W + b ; y *= dropout_mask ; r = x + y ; out = LayerNorm(r)."""
    if use_mask:
        x_ref, mask_ref, w_ref, b_ref, g_ref, beta_ref, o_ref = refs
    else:
        x_ref, w_ref, b_ref, g_ref, beta_ref, o_ref = refs

    x = x_ref[...].astype(jnp.float32)                         # (TM, D)
    w = w_ref[...].astype(jnp.float32)                         # (D, D)
    b = b_ref[...].astype(jnp.float32)                         # (1, D)

    # Sublayer: linear projection on the MXU (large M now that TM is big).
    y = jnp.dot(x, w, preferred_element_type=jnp.float32) + b

    # Dropout: mask already holds {0, 1/(1-p)} (inverted scaling); elided at
    # trace time in eval mode.
    if use_mask:
        y = y * mask_ref[...].astype(jnp.float32)

    # Residual add.
    r = x + y

    # LayerNorm over the hidden axis (biased variance, like nn.LayerNorm).
    mean = jnp.mean(r, axis=-1, keepdims=True)
    cent = r - mean
    var = jnp.mean(cent * cent, axis=-1, keepdims=True)
    inv = lax.rsqrt(var + LN_EPS)
    gamma = g_ref[...].astype(jnp.float32)                     # (1, D)
    beta = beta_ref[...].astype(jnp.float32)                   # (1, D)
    o_ref[...] = (cent * inv * gamma + beta).astype(o_ref.dtype)


def _pick_row_tile(rows, d, itemsize):
    """Whole (B*S, D) slab if an x-block stays under ~2 MiB (trivial VMEM on
    v5e/v6e/v7x even with double-buffered x/mask/out); otherwise the largest
    multiple-of-8 divisor of `rows` under that budget."""
    budget_rows = max(256, (2 << 20) // (d * itemsize))
    if rows <= budget_rows:
        return rows
    t = budget_rows - (budget_rows % 8)
    while t >= 8:
        if rows % t == 0:
            return t
        t -= 8
    return rows  # full-extent block is always legal; VMEM re-check needed if huge.


def residual_connection(x, w, b, gamma, beta, *, dropout_p=0.2, training=False,
                        rng_key=None, row_tile=None):
    """x: (B, S, D); w: (D, D) with y = x @ w + b; gamma/beta: (D,)."""
    B, S, D = x.shape
    rows = B * S
    if row_tile is None:
        row_tile = _pick_row_tile(rows, D, jnp.dtype(x.dtype).itemsize)
    assert rows % row_tile == 0, "row count must be a multiple of row_tile"

    x2 = x.reshape(rows, D)
    b2 = b.reshape(1, D)
    g2 = gamma.reshape(1, D)
    be2 = beta.reshape(1, D)

    use_mask = bool(training) and dropout_p > 0.0

    inputs = [x2]
    in_specs = [pl.BlockSpec((row_tile, D), lambda i: (i, 0))]        # x rows
    if use_mask:
        if dropout_p >= 1.0:
            mask2 = jnp.zeros((rows, D), dtype=x.dtype)               # drop all
        else:
            assert rng_key is not None, "training mode needs rng_key"
            keep = jax.random.bernoulli(rng_key, 1.0 - dropout_p, (rows, D))
            mask2 = keep.astype(x.dtype) * (1.0 / (1.0 - dropout_p))
        inputs.append(mask2)
        in_specs.append(pl.BlockSpec((row_tile, D), lambda i: (i, 0)))  # mask rows
    inputs += [w, b2, g2, be2]
    in_specs += [
        pl.BlockSpec((D, D), lambda i: (0, 0)),   # W      (resident, constant map)
        pl.BlockSpec((1, D), lambda i: (0, 0)),   # bias
        pl.BlockSpec((1, D), lambda i: (0, 0)),   # gamma
        pl.BlockSpec((1, D), lambda i: (0, 0)),   # beta
    ]

    out = pl.pallas_call(
        functools.partial(_residual_ln_kernel, use_mask=use_mask),
        out_shape=jax.ShapeDtypeStruct((rows, D), x.dtype),
        grid=(rows // row_tile,),
        in_specs=in_specs,
        out_specs=pl.BlockSpec((row_tile, D), lambda i: (i, 0)),
        # Row blocks are independent -> "parallel" lets v7x split the grid
        # across both TensorCores; no effect on single-TC v5e/v6e.
        compiler_params=pltpu.CompilerParams(
            dimension_semantics=("parallel",)),
    )(*inputs)

    return out.reshape(B, S, D)


def _reference(x, w, b, gamma, beta, mask=None):
    """Pure-JAX reference. mask (if given) already holds {0, 1/(1-p)}."""
    y = jnp.einsum("bsd,de->bse", x, w, precision="highest") + b
    if mask is not None:
        y = y * mask
    r = x + y
    mean = jnp.mean(r, axis=-1, keepdims=True)
    var = jnp.mean((r - mean) ** 2, axis=-1, keepdims=True)
    return (r - mean) / jnp.sqrt(var + LN_EPS) * gamma + beta


if __name__ == "__main__":
    key = jax.random.PRNGKey(0)
    B, S, D = 2, 8, 32          # small (batch, seq, hidden) consistent with the module
    DROPOUT_P = 0.2

    k_x, k_w, k_b, k_drop = jax.random.split(key, 4)
    x = jax.random.uniform(k_x, (B, S, D), dtype=jnp.float32)

    # Deterministic nn.Linear(D, D) init (uniform +-1/sqrt(D), seeded).
    bound = 1.0 / (D ** 0.5)
    w = jax.random.uniform(k_w, (D, D), minval=-bound, maxval=bound,
                           dtype=jnp.float32)          # stored (in, out): y = x @ w
    b = jax.random.uniform(k_b, (D,), minval=-bound, maxval=bound,
                           dtype=jnp.float32)
    gamma = jnp.ones((D,), dtype=jnp.float32)           # nn.LayerNorm default init
    beta = jnp.zeros((D,), dtype=jnp.float32)

    # Tolerance leaves room for a possible reduced-precision MXU pass on f32
    # operands; any real bug (wrong residual/LN axis/mask) gives O(0.1+) errors.
    TOL = dict(atol=5e-3, rtol=5e-3)

    # --- Eval mode (dropout == identity), matches module.eval() semantics. ---
    out = residual_connection(x, w, b, gamma, beta, dropout_p=DROPOUT_P,
                              training=False)
    out = jax.block_until_ready(out)
    assert out.shape == (B, S, D)
    assert jnp.allclose(out, _reference(x, w, b, gamma, beta), **TOL)

    # --- Training mode: fused dropout via a deterministic precomputed mask. ---
    out_tr = residual_connection(x, w, b, gamma, beta, dropout_p=DROPOUT_P,
                                 training=True, rng_key=k_drop)
    out_tr = jax.block_until_ready(out_tr)
    keep = jax.random.bernoulli(k_drop, 1.0 - DROPOUT_P, (B * S, D))
    mask = (keep.astype(jnp.float32) / (1.0 - DROPOUT_P)).reshape(B, S, D)
    assert jnp.allclose(out_tr, _reference(x, w, b, gamma, beta, mask=mask), **TOL)

    # --- Reference-scale problem from the spec (X = torch.rand(32, 64, 32)):
    #     rows = 2048 -> processed as a single whole-slab grid step. ---
    xb = jax.random.uniform(jax.random.PRNGKey(1), (32, 64, 32), dtype=jnp.float32)
    out_big = jax.block_until_ready(
        residual_connection(xb, w, b, gamma, beta, training=False))
    assert jnp.allclose(out_big, _reference(xb, w, b, gamma, beta), **TOL)

    print("KERNEL_OK")
</pallas_src>

<mosaic_0001>
module attributes {stable_mosaic.version = 11 : i64} {
  func.func @_residual_ln_kernel(%arg0: i32, %arg1: memref<16x32xf32, #tpu.memory_space<vmem>>, %arg2: memref<32x32xf32, #tpu.memory_space<vmem>>, %arg3: memref<1x32xf32, #tpu.memory_space<vmem>>, %arg4: memref<1x32xf32, #tpu.memory_space<vmem>>, %arg5: memref<1x32xf32, #tpu.memory_space<vmem>>, %arg6: memref<16x32xf32, #tpu.memory_space<vmem>>) attributes {dimension_semantics = [#tpu.dimension_semantics<parallel>], iteration_bounds = array<i64: 1>, scalar_prefetch = 0 : i64, scratch_operands = 0 : i64, tpu.core_type = #tpu.core_type<tc>, window_params = [{transform_indices = @transform_0, window_bounds = array<i64: 16, 32>}, {pipeline_mode = #tpu.pipeline_mode<synchronous>, transform_indices = @transform_1, window_bounds = array<i64: 32, 32>}, {pipeline_mode = #tpu.pipeline_mode<synchronous>, transform_indices = @transform_2, window_bounds = array<i64: 1, 32>}, {pipeline_mode = #tpu.pipeline_mode<synchronous>, transform_indices = @transform_3, window_bounds = array<i64: 1, 32>}, {pipeline_mode = #tpu.pipeline_mode<synchronous>, transform_indices = @transform_4, window_bounds = array<i64: 1, 32>}, {transform_indices = @transform_5, window_bounds = array<i64: 16, 32>}]} {
    %c0 = arith.constant 0 : index
    %c0_0 = arith.constant 0 : index
    %0 = vector.load %arg1[%c0, %c0_0] : memref<16x32xf32, #tpu.memory_space<vmem>>, vector<16x32xf32>
    %c0_1 = arith.constant 0 : index
    %c0_2 = arith.constant 0 : index
    %1 = vector.load %arg2[%c0_1, %c0_2] : memref<32x32xf32, #tpu.memory_space<vmem>>, vector<32x32xf32>
    %c0_3 = arith.constant 0 : index
    %c0_4 = arith.constant 0 : index
    %2 = vector.load %arg3[%c0_3, %c0_4] : memref<1x32xf32, #tpu.memory_space<vmem>>, vector<1x32xf32>
    %cst = arith.constant dense<0.000000e+00> : vector<16x32xf32>
    %3 = tpu.matmul %0, %1, %cst {dimension_numbers = #tpu.dot_dimension_numbers<[1], [0], [0], [1], [0, 0, 1, 1], [], []>} : vector<16x32xf32>, vector<32x32xf32>, vector<16x32xf32> -> vector<16x32xf32>
    %4 = vector.broadcast %2 : vector<1x32xf32> to vector<16x32xf32>
    %5 = arith.addf %3, %4 : vector<16x32xf32>
    %6 = arith.addf %0, %5 : vector<16x32xf32>
    %cst_5 = arith.constant dense<0.000000e+00> : vector<16xf32>
    %7 = vector.multi_reduction <add>, %6, %cst_5 [1] : vector<16x32xf32> to vector<16xf32>
    %8 = vector.shape_cast %7 : vector<16xf32> to vector<16x1xf32>
    %cst_6 = arith.constant 3.200000e+01 : f32
    %9 = vector.broadcast %cst_6 : f32 to vector<16x1xf32>
    %10 = arith.divf %8, %9 : vector<16x1xf32>
    %11 = vector.broadcast %10 : vector<16x1xf32> to vector<16x32xf32>
    %12 = arith.subf %6, %11 : vector<16x32xf32>
    %13 = arith.mulf %12, %12 : vector<16x32xf32>
    %cst_7 = arith.constant dense<0.000000e+00> : vector<16xf32>
    %14 = vector.multi_reduction <add>, %13, %cst_7 [1] : vector<16x32xf32> to vector<16xf32>
    %15 = vector.shape_cast %14 : vector<16xf32> to vector<16x1xf32>
    %cst_8 = arith.constant 3.200000e+01 : f32
    %16 = vector.broadcast %cst_8 : f32 to vector<16x1xf32>
    %17 = arith.divf %15, %16 : vector<16x1xf32>
    %cst_9 = arith.constant 9.99999974E-6 : f32
    %18 = vector.broadcast %cst_9 : f32 to vector<16x1xf32>
    %19 = arith.addf %17, %18 : vector<16x1xf32>
    %20 = math.rsqrt %19 : vector<16x1xf32>
    %c0_10 = arith.constant 0 : index
    %c0_11 = arith.constant 0 : index
    %21 = vector.load %arg4[%c0_10, %c0_11] : memref<1x32xf32, #tpu.memory_space<vmem>>, vector<1x32xf32>
    %c0_12 = arith.constant 0 : index
    %c0_13 = arith.constant 0 : index
    %22 = vector.load %arg5[%c0_12, %c0_13] : memref<1x32xf32, #tpu.memory_space<vmem>>, vector<1x32xf32>
    %23 = vector.broadcast %20 : vector<16x1xf32> to vector<16x32xf32>
    %24 = arith.mulf %12, %23 : vector<16x32xf32>
    %25 = vector.broadcast %21 : vector<1x32xf32> to vector<16x32xf32>
    %26 = arith.mulf %24, %25 : vector<16x32xf32>
    %27 = vector.broadcast %22 : vector<1x32xf32> to vector<16x32xf32>
    %28 = arith.addf %26, %27 : vector<16x32xf32>
    %c0_14 = arith.constant 0 : index
    %c0_15 = arith.constant 0 : index
    %29 = vector.load %arg6[%c0_14, %c0_15] : memref<16x32xf32, #tpu.memory_space<vmem>>, vector<16x32xf32>
    tpu.vector_store %arg6[%c0_14, %c0_15], %28 {strides = array<i32>} : memref<16x32xf32, #tpu.memory_space<vmem>>, vector<16x32xf32>,
    return
  }
  func.func @transform_0(%arg0: i32) -> (i32, i32) {
    %c0_i32 = arith.constant 0 : i32
    %c0_i32_0 = arith.constant 0 : i32
    return %arg0, %c0_i32 : i32, i32
  }
  func.func @transform_1(%arg0: i32) -> (i32, i32) {
    %c0_i32 = arith.constant 0 : i32
    %c0_i32_0 = arith.constant 0 : i32
    %c0_i32_1 = arith.constant 0 : i32
    return %c0_i32, %c0_i32_0 : i32, i32
  }
  func.func @transform_2(%arg0: i32) -> (i32, i32) {
    %c0_i32 = arith.constant 0 : i32
    %c0_i32_0 = arith.constant 0 : i32
    %c0_i32_1 = arith.constant 0 : i32
    return %c0_i32, %c0_i32_0 : i32, i32
  }
  func.func @transform_3(%arg0: i32) -> (i32, i32) {
    %c0_i32 = arith.constant 0 : i32
    %c0_i32_0 = arith.constant 0 : i32
    %c0_i32_1 = arith.constant 0 : i32
    return %c0_i32, %c0_i32_0 : i32, i32
  }
  func.func @transform_4(%arg0: i32) -> (i32, i32) {
    %c0_i32 = arith.constant 0 : i32
    %c0_i32_0 = arith.constant 0 : i32
    %c0_i32_1 = arith.constant 0 : i32
    return %c0_i32, %c0_i32_0 : i32, i32
  }
  func.func @transform_5(%arg0: i32) -> (i32, i32) {
    %c0_i32 = arith.constant 0 : i32
    %c0_i32_0 = arith.constant 0 : i32
    return %arg0, %c0_i32 : i32, i32
  }
}

</mosaic_0001>

<bundles_post_ra>
// kernel: tpu_custom_call.1
= control target key start
LH: loop header
LB: loop body
LE: loop exit
PB: predicated region body
PF: predicated region fallthrough
CT: control target
= control target key end

     0   :  { %10 = vsyncpa [#allocation3], 0  ;;  %s350_s0 = inlined_call_operand.hbm [shape: f32[16,32], index: 0, kind: input, shape index: {}]   ;;  %s351_s1 = inlined_call_operand.hbm [shape: f32[32,32], index: 1, kind: input, shape index: {}]   ;;  %s352_s2 = inlined_call_operand.vmem [shape: f32[1,32], index: 2, kind: input, shape index: {}]   ;;  %s353_s3 = inlined_call_operand.vmem [shape: f32[1,32], index: 3, kind: input, shape index: {}]   ;;  %s354_s4 = inlined_call_operand.vmem [shape: f32[1,32], index: 4, kind: input, shape index: {}]   ;;  %s355_s5 = inlined_call_operand.hbm [shape: f32[16,32], index: 5, kind: output, shape index: {}]  }
   0x1   :  { %11 = vsyncpa [#allocation6], 0 }
   0x2   :  { %12 = vsyncpa [#allocation4], 0  ;;  %s17_s20 = sshll.u32 %s350_s0, 4  ;;  %s279_s21 = smov [#allocation2]   ;;  %s18_s20 = int_to_ptr.hbm [resolvable:$true] %s17_s20 }
   0x3   :  { %s19_s22 = sshll.u32 %s279_s21, 4  ;;  %s30_s25 = sshll.u32 %s351_s1, 4  ;;  %s20_s22 = int_to_ptr.vmem [resolvable:$true] %s19_s22  ;;  %s31_s25 = int_to_ptr.hbm [resolvable:$true] %s30_s25 }
   0x4   :  { %s280_s26 = smov 128   ;;  %s281_s27 = smov 8  }
   0x5   :  { %25 = dma.hbm_to_vmem [thread:$0]  %s18_s20, 256, %s20_s22, [#allocation3], %s280_s26, %s280_s26, %s281_s27  }
   0x6   :  { %s282_s28 = smov [#allocation5]  }
   0x7   :  { %s32_s29 = sshll.u32 %s282_s28, 4  ;;  %s33_s29 = int_to_ptr.vmem [resolvable:$true] %s32_s29 }
   0x8   :  { %38 = dma.hbm_to_vmem [thread:$0]  %s31_s25, 512, %s33_s29, [#allocation6], %s280_s26, %s280_s26, %s281_s27  }
   0x9   :  { %273 = dma.done.wait [#allocation3], 256  }
   0xa   :  { %274 = vsyncadd [#allocation3], 4294967040 }
   0xb   :  { %275 = dma.done.wait [#allocation6], 512  }
   0xc   :  { %276 = vsyncadd [#allocation6], 4294966784  ;;  %v58_v0 = vld [vmem:[#allocation5 + $0x18] sm:$0xff]  ;;  %v57_v1 = vld [vmem:[#allocation5 + $0x10] sm:$0xff]  ;;  %vm63_vm0 = vcmask 261120   ;;  %v283_v15 = vmov 32.0  }
   0xd   :  { %82 = vmatpush.msra.mxu0 %v58_v0  ;;  %182 = vmatpush.msra.mxu1 %v58_v0  ;;  %v56_v2 = vld [vmem:[#allocation5 + $0x8] sm:$0xff]  ;;  %v55_v3 = vld [vmem:[#allocation5] sm:$0xff]  ;;  %v53_v4 = vld [vmem:[#allocation2] sm:$0xff]  ;;  %195 = vrcp.f32 %v283_v15  ;;  %s166_s11 = sshll.u32 %s355_s5, 4  ;;  %s167_s11 = int_to_ptr.hbm [resolvable:$true] %s166_s11 }
   0xe   :  { %v54_v5 = vld [vmem:[#allocation2 + $0x8] sm:$0xff]  ;;  %v192_v6 = vld [vmem:[%s352_s2] ss:$0 sm:$0xff] }
   0xf   :  { %83 = vmatpush.msra.mxu0 %v57_v1  ;;  %183 = vmatpush.msra.mxu1 %v57_v1  ;;  %v193_v46 = vld [vmem:[%s353_s3] ss:$0 sm:$0xff]  ;;  %s284_s3 = smov [#allocation7]  }
  0x10   :  { %v194_v50 = vld [vmem:[%s354_s4] ss:$0 sm:$0xff]  ;;  %s164_s8 = sshll.u32 %s284_s3, 4  ;;  %s165_s8 = int_to_ptr.vmem [resolvable:$true] %s164_s8 }
  0x11   :  { %84 = vmatpush.msra.mxu0 %v56_v2  ;;  %184 = vmatpush.msra.mxu1 %v56_v2 }
  0x13   :  { %85 = vmatpush.msra.mxu0 %v55_v3  ;;  %185 = vmatpush.msra.mxu1 %v55_v3  ;;  %v196_v16 = vpop.eup %195 }
  0x14   :  { %180 = vmatmul.msk.f32.vlgmr.msra.gmra.mxu0 %vm63_vm0, %v53_v4  ;;  %181 = vmatmul.msk.f32.vlgmr.msra.gmra.mxu1 %vm63_vm0, %v54_v5  ;;  %v102_v17 = vmul.f32 32.0, %v196_v16  ;;  %vm106_vm1 = vweird.f32 %v196_v16 }
  0x16   :  { %v103_v18 = vsub.f32 1.0, %v102_v17 }
  0x18   :  { %v104_v19 = vmul.f32 %v196_v16, %v103_v18 }
  0x1a   :  { %v105_v20 = vadd.f32 %v196_v16, %v104_v19 }
  0x1c   :  { %v107_v21 = vsel %vm106_vm1, %v196_v16, %v105_v20 }
  0x91   :  { %v87_v7 = vpop.f32.mrf.mxu0  ;;  %v90_v8 = vpop.f32.mrf.mxu1 }
  0x92   :  { %v88_v9 = vadd.f32 %v192_v6, %v87_v7  ;;  %v91_v11 = vadd.f32 %v192_v6, %v90_v8 }
  0x94   :  { %v93_v10 = vadd.f32 %v88_v9, %v53_v4  ;;  %v94_v13 = vadd.f32 %v91_v11, %v54_v5 }
  0x96   :  { %v95_v12 = vsel %vm63_vm0, %v93_v10, 0.0  ;;  %v98_v14 = vsel %vm63_vm0, %v94_v13, 0.0 }
  0x97   :  { %96 = vadd.xlane.f32.xlu0 %v95_v12 }
  0x9f   :  { %99 = vadd.xlane.f32.xlu0 %v98_v14 }
 0x10a   :  { %v97_v22 = vpop.xlane.xlu0 %96 }
 0x10b   :  { %v108_v23 = vmul.f32 %v107_v21, %v97_v22 }
 0x10d   :  { %v110_v24 = vsub.f32 %v93_v10, %v108_v23 }
 0x10f   :  { %v112_v25 = vmul.f32 %v110_v24, %v110_v24 }
 0x111   :  { %v114_v26 = vsel %vm63_vm0, %v112_v25, 0.0 }
 0x112   :  { %115 = vadd.xlane.f32.xlu1 %v114_v26  ;;  %v100_v27 = vpop.xlane.xlu0 %99 }
 0x113   :  { %v109_v28 = vmul.f32 %v107_v21, %v100_v27 }
 0x115   :  { %v111_v29 = vsub.f32 %v94_v13, %v109_v28 }
 0x117   :  { %v113_v30 = vmul.f32 %v111_v29, %v111_v29 }
 0x119   :  { %v117_v31 = vsel %vm63_vm0, %v113_v30, 0.0 }
 0x11a   :  { %118 = vadd.xlane.f32.xlu1 %v117_v31 }
 0x185   :  { %v116_v32 = vpop.xlane.xlu1 %115 }
 0x186   :  { %v120_v33 = vmul.f32 %v116_v32, %v107_v21 }
 0x188   :  { %v122_v34 = vadd.f32 1e-05, %v120_v33 }
 0x18a   :  { %197 = vrsqrt.f32 %v122_v34  ;;  %vm130_vm3 = vweird.f32 %v122_v34 }
 0x18d   :  { %v119_v35 = vpop.xlane.xlu1 %118 }
 0x18e   :  { %v121_v36 = vmul.f32 %v119_v35, %v107_v21 }
 0x190   :  { %v198_v37 = vpop.eup %197  ;;  %v123_v38 = vadd.f32 1e-05, %v121_v36 }
 0x191   :  { %v125_v39 = vmul.f32 %v198_v37, %v122_v34  ;;  %vm131_vm2 = vweird.f32 %v198_v37 }
 0x192   :  { %199 = vrsqrt.f32 %v123_v38  ;;  %vm132_vm4 = vmor %vm130_vm3, %vm131_vm2  ;;  %vm140_vm6 = vweird.f32 %v123_v38 }
 0x193   :  { %v126_v40 = vmul.f32 %v198_v37, %v125_v39 }
 0x195   :  { %v127_v41 = vmul.f32 0.5, %v126_v40 }
 0x197   :  { %v128_v42 = vsub.f32 1.5, %v127_v41 }
 0x198   :  { %v200_v43 = vpop.eup %199 }
 0x199   :  { %v129_v44 = vmul.f32 %v198_v37, %v128_v42  ;;  %v135_v45 = vmul.f32 %v200_v43, %v123_v38  ;;  %vm141_vm5 = vweird.f32 %v200_v43 }
 0x19a   :  { %vm142_vm7 = vmor %vm140_vm6, %vm141_vm5 }
 0x19b   :  { %v133_v47 = vsel %vm132_vm4, %v198_v37, %v129_v44  ;;  %v136_v48 = vmul.f32 %v200_v43, %v135_v45 }
 0x19c   :  { %v146_v49 = vmul.f32 %v133_v47, %v110_v24 }
 0x19d   :  { %v137_v51 = vmul.f32 0.5, %v136_v48 }
 0x19e   :  { %v151_v52 = vmul.f32 %v193_v46, %v146_v49 }
 0x19f   :  { %v138_v53 = vsub.f32 1.5, %v137_v51 }
 0x1a0   :  { %v156_v54 = vadd.f32 %v194_v50, %v151_v52 }
 0x1a1   :  { %v139_v55 = vmul.f32 %v200_v43, %v138_v53 }
 0x1a2   :  { %158 = vst.msk [vmem:[#allocation7] sm:$0xff] %vm63_vm0, %v156_v54 }
 0x1a3   :  { %v143_v56 = vsel %vm142_vm7, %v200_v43, %v139_v55 }
 0x1a4   :  { %v147_v57 = vmul.f32 %v143_v56, %v111_v29 }
 0x1a6   :  { %v152_v58 = vmul.f32 %v193_v46, %v147_v57 }
 0x1a8   :  { %v157_v59 = vadd.f32 %v194_v50, %v152_v58 }
 0x1aa   :  { %159 = vst.msk [vmem:[#allocation7 + $0x8] sm:$0xff] %vm63_vm0, %v157_v59 }
 0x1ab   :  { %172 = dma.vmem_to_hbm [thread:$0]  %s165_s8, 256, %s167_s11, [#allocation4], %s280_s26, %s280_s26, %s281_s27  }
 0x1ac   :  { %277 = dma.done.wait [#allocation4], 256  }
 0x1ad   :  { %278 = vsyncadd [#allocation4], 4294967040 }
 0x1ae   :  { %177 = vsyncpa [#allocation3], 1 }
 0x1af   :  { %178 = vsyncpa [#allocation6], 1 }
 0x1b0   :  { %179 = vsyncpa [#allocation4], 1 }

</bundles_post_ra>
